<compile_context>
chip_gen: v5e
topology: v5e:2x2
jax: 0.10.0
libtpu: 0.0.40
codegen_flags: <defaults>
</compile_context>

<pallas_src>
import jax
import jax.numpy as jnp
from jax import lax
from jax.experimental import pallas as pl
from jax.experimental.pallas import tpu as pltpu


def mlp_kernel(x_ref, w1_ref, b1_ref, w2_ref, b2_ref, o_ref, acc_ref):
    # Grid: (batch tiles [parallel], K tiles [arbitrary, reduction]).
    k = pl.program_id(1)

    @pl.when(k == 0)
    def _():
        acc_ref[...] = jnp.zeros_like(acc_ref)

    # fc1 partial product: x_blk (tm, tk) contracted with w1_blk (H, tk) on
    # dim 1 of both -> (tm, H).  Weights stay in PyTorch (out, in) layout.
    acc_ref[...] += lax.dot_general(
        x_ref[...], w1_ref[...],
        dimension_numbers=(((1,), (1,)), ((), ())),
        preferred_element_type=jnp.float32,
    )

    @pl.when(k == pl.num_programs(1) - 1)
    def _():
        # Finalize: bias + ReLU in f32, then fc2 (also (out, in) layout) + bias.
        h = jnp.maximum(acc_ref[...] + b1_ref[...], 0.0)
        out = lax.dot_general(
            h, w2_ref[...],
            dimension_numbers=(((1,), (1,)), ((), ())),
            preferred_element_type=jnp.float32,
        )
        o_ref[...] = (out + b2_ref[...]).astype(o_ref.dtype)


def _pick_tile(dim, target, multiple):
    """Largest divisor of `dim` that is <= target and a multiple of `multiple`;
    fall back to the full extent (always legal: block == full array dim)."""
    if dim <= target:
        return dim
    best = None
    t = min(target, dim)
    for cand in range(t, 0, -1):
        if dim % cand == 0 and cand % multiple == 0:
            best = cand
            break
    return best if best is not None else dim


def mlp_forward(x, w1, b1, w2, b2, *, tm=None, tk=None):
    """x: (B, C, H, W) float32 (NCHW); flattened to (B, input_size).
       Weights in PyTorch convention (no transposes performed here):
         w1: (hidden, input_size), b1: (hidden,)
         w2: (output, hidden),     b2: (output,)
    """
    batch = x.shape[0]
    x2d = x.reshape(batch, -1)                  # x.view(x.size(0), -1)
    input_size = x2d.shape[1]
    hidden_size = w1.shape[0]
    output_size = w2.shape[0]

    # Keep biases 2D for lane-major broadcast inside the kernel.
    b1_2d = b1.reshape(1, hidden_size)
    b2_2d = b2.reshape(1, output_size)

    # Tile selection: batch tile on sublane axis (multiple of 8 when tiled),
    # K tile on lane axis (multiple of 128 when tiled).
    if tm is None:
        tm = _pick_tile(batch, 256, 8)
    if tk is None:
        tk = _pick_tile(input_size, 512, 128)

    grid = (batch // tm, input_size // tk)

    return pl.pallas_call(
        mlp_kernel,
        out_shape=jax.ShapeDtypeStruct((batch, output_size), x.dtype),
        grid_spec=pltpu.PrefetchScalarGridSpec(
            num_scalar_prefetch=0,
            grid=grid,
            in_specs=[
                # x: tiled over (batch, K)
                pl.BlockSpec((tm, tk), lambda i, k: (i, k)),
                # w1 (hidden, input_size): tiled over K only
                pl.BlockSpec((hidden_size, tk), lambda i, k: (0, k)),
                # b1 (1, hidden): resident full block
                pl.BlockSpec((1, hidden_size), lambda i, k: (0, 0)),
                # w2 (output, hidden): resident full block
                pl.BlockSpec((output_size, hidden_size), lambda i, k: (0, 0)),
                # b2 (1, output): resident full block
                pl.BlockSpec((1, output_size), lambda i, k: (0, 0)),
            ],
            # Output block index fixed across the K axis -> stays resident;
            # written only on the final K step inside pl.when.
            out_specs=pl.BlockSpec((tm, output_size), lambda i, k: (i, 0)),
            scratch_shapes=[pltpu.VMEM((tm, hidden_size), jnp.float32)],
        ),
        compiler_params=pltpu.CompilerParams(
            # Batch axis shards across TensorCores on v7x; K axis is a
            # sequential reduction.
            dimension_semantics=("parallel", "arbitrary"),
        ),
    )(x2d, w1, b1_2d, w2, b2_2d)


if __name__ == "__main__":
    # Small shapes consistent with the module: image batch flattened to an MLP.
    batch, channels, spatial = 2, 4, 16
    input_size = channels * spatial * spatial   # 1024
    hidden_size = 32
    output_size = 10

    key = jax.random.PRNGKey(0)
    kx, kw1, kb1, kw2, kb2 = jax.random.split(key, 5)

    x = jax.random.normal(kx, (batch, channels, spatial, spatial), dtype=jnp.float32)

    # Deterministic parameter init (PyTorch Linear-style uniform bounds).
    bound1 = 1.0 / (input_size ** 0.5)
    w1 = jax.random.uniform(kw1, (hidden_size, input_size), jnp.float32, -bound1, bound1)
    b1 = jax.random.uniform(kb1, (hidden_size,), jnp.float32, -bound1, bound1)
    bound2 = 1.0 / (hidden_size ** 0.5)
    w2 = jax.random.uniform(kw2, (output_size, hidden_size), jnp.float32, -bound2, bound2)
    b2 = jax.random.uniform(kb2, (output_size,), jnp.float32, -bound2, bound2)

    out = mlp_forward(x, w1, b1, w2, b2)
    jax.block_until_ready(out)

    # Pure-JAX reference check.
    x2d = x.reshape(batch, -1)
    ref = jnp.maximum(x2d @ w1.T + b1, 0.0) @ w2.T + b2
    assert out.shape == (batch, output_size)
    assert jnp.allclose(out, ref, atol=1e-4, rtol=1e-4)

    print("KERNEL_OK")
</pallas_src>

<mosaic_0001>
module attributes {stable_mosaic.version = 11 : i64} {
  func.func @mlp_kernel(%arg0: i32, %arg1: i32, %arg2: memref<2x512xf32, #tpu.memory_space<vmem>>, %arg3: memref<32x512xf32, #tpu.memory_space<vmem>>, %arg4: memref<1x32xf32, #tpu.memory_space<vmem>>, %arg5: memref<10x32xf32, #tpu.memory_space<vmem>>, %arg6: memref<1x10xf32, #tpu.memory_space<vmem>>, %arg7: memref<2x10xf32, #tpu.memory_space<vmem>>, %arg8: memref<2x32xf32, #tpu.memory_space<vmem>>) attributes {dimension_semantics = [#tpu.dimension_semantics<parallel>, #tpu.dimension_semantics<arbitrary>], iteration_bounds = array<i64: 1, 2>, scalar_prefetch = 0 : i64, scratch_operands = 1 : i64, tpu.core_type = #tpu.core_type<tc>, window_params = [{transform_indices = @transform_0, window_bounds = array<i64: 2, 512>}, {transform_indices = @transform_1, window_bounds = array<i64: 32, 512>}, {pipeline_mode = #tpu.pipeline_mode<synchronous>, transform_indices = @transform_2, window_bounds = array<i64: 1, 32>}, {pipeline_mode = #tpu.pipeline_mode<synchronous>, transform_indices = @transform_3, window_bounds = array<i64: 10, 32>}, {pipeline_mode = #tpu.pipeline_mode<synchronous>, transform_indices = @transform_4, window_bounds = array<i64: 1, 10>}, {transform_indices = @transform_5, window_bounds = array<i64: 2, 10>}]} {
    %c0_i32 = arith.constant 0 : i32
    %0 = arith.cmpi eq, %arg1, %c0_i32 : i32
    %1 = arith.extui %0 : i1 to i32
    %c0_i32_0 = arith.constant 0 : i32
    %2 = arith.cmpi ne, %1, %c0_i32_0 : i32
    scf.if %2 {
      %cst_9 = arith.constant 0.000000e+00 : f32
      %12 = vector.broadcast %cst_9 : f32 to vector<2x32xf32>
      %c0_10 = arith.constant 0 : index
      %c0_11 = arith.constant 0 : index
      %13 = vector.load %arg8[%c0_10, %c0_11] : memref<2x32xf32, #tpu.memory_space<vmem>>, vector<2x32xf32>
      tpu.vector_store %arg8[%c0_10, %c0_11], %12 {strides = array<i32>} : memref<2x32xf32, #tpu.memory_space<vmem>>, vector<2x32xf32>,
    } else {
    }
    %c0 = arith.constant 0 : index
    %c0_1 = arith.constant 0 : index
    %3 = vector.load %arg8[%c0, %c0_1] : memref<2x32xf32, #tpu.memory_space<vmem>>, vector<2x32xf32>
    %c0_2 = arith.constant 0 : index
    %c0_3 = arith.constant 0 : index
    %4 = vector.load %arg2[%c0_2, %c0_3] : memref<2x512xf32, #tpu.memory_space<vmem>>, vector<2x512xf32>
    %c0_4 = arith.constant 0 : index
    %c0_5 = arith.constant 0 : index
    %5 = vector.load %arg3[%c0_4, %c0_5] : memref<32x512xf32, #tpu.memory_space<vmem>>, vector<32x512xf32>
    %cst = arith.constant dense<0.000000e+00> : vector<2x32xf32>
    %6 = tpu.matmul %4, %5, %cst {dimension_numbers = #tpu.dot_dimension_numbers<[1], [1], [0], [0], [0, 0, 1, 0], [], []>} : vector<2x512xf32>, vector<32x512xf32>, vector<2x32xf32> -> vector<2x32xf32>
    %7 = arith.addf %3, %6 : vector<2x32xf32>
    %c0_6 = arith.constant 0 : index
    %c0_7 = arith.constant 0 : index
    %8 = vector.load %arg8[%c0_6, %c0_7] : memref<2x32xf32, #tpu.memory_space<vmem>>, vector<2x32xf32>
    tpu.vector_store %arg8[%c0_6, %c0_7], %7 {strides = array<i32>} : memref<2x32xf32, #tpu.memory_space<vmem>>, vector<2x32xf32>,
    %c1_i32 = arith.constant 1 : i32
    %9 = arith.cmpi eq, %arg1, %c1_i32 : i32
    %10 = arith.extui %9 : i1 to i32
    %c0_i32_8 = arith.constant 0 : i32
    %11 = arith.cmpi ne, %10, %c0_i32_8 : i32
    scf.if %11 {
      %c0_9 = arith.constant 0 : index
      %c0_10 = arith.constant 0 : index
      %12 = vector.load %arg8[%c0_9, %c0_10] : memref<2x32xf32, #tpu.memory_space<vmem>>, vector<2x32xf32>
      %c0_11 = arith.constant 0 : index
      %c0_12 = arith.constant 0 : index
      %13 = vector.load %arg4[%c0_11, %c0_12] : memref<1x32xf32, #tpu.memory_space<vmem>>, vector<1x32xf32>
      %14 = vector.broadcast %13 : vector<1x32xf32> to vector<2x32xf32>
      %15 = arith.addf %12, %14 : vector<2x32xf32>
      %cst_13 = arith.constant 0.000000e+00 : f32
      %16 = vector.broadcast %cst_13 : f32 to vector<2x32xf32>
      %17 = arith.maximumf %15, %16 : vector<2x32xf32>
      %c0_14 = arith.constant 0 : index
      %c0_15 = arith.constant 0 : index
      %18 = vector.load %arg5[%c0_14, %c0_15] : memref<10x32xf32, #tpu.memory_space<vmem>>, vector<10x32xf32>
      %cst_16 = arith.constant dense<0.000000e+00> : vector<2x10xf32>
      %19 = tpu.matmul %17, %18, %cst_16 {dimension_numbers = #tpu.dot_dimension_numbers<[1], [1], [0], [0], [0, 0, 1, 0], [], []>} : vector<2x32xf32>, vector<10x32xf32>, vector<2x10xf32> -> vector<2x10xf32>
      %c0_17 = arith.constant 0 : index
      %c0_18 = arith.constant 0 : index
      %20 = vector.load %arg6[%c0_17, %c0_18] : memref<1x10xf32, #tpu.memory_space<vmem>>, vector<1x10xf32>
      %21 = vector.broadcast %20 : vector<1x10xf32> to vector<2x10xf32>
      %22 = arith.addf %19, %21 : vector<2x10xf32>
      %c0_19 = arith.constant 0 : index
      %c0_20 = arith.constant 0 : index
      %23 = vector.load %arg7[%c0_19, %c0_20] : memref<2x10xf32, #tpu.memory_space<vmem>>, vector<2x10xf32>
      tpu.vector_store %arg7[%c0_19, %c0_20], %22 {strides = array<i32>} : memref<2x10xf32, #tpu.memory_space<vmem>>, vector<2x10xf32>,
    } else {
    }
    return
  }
  func.func @transform_0(%arg0: i32, %arg1: i32) -> (i32, i32) {
    %c0_i32 = arith.constant 0 : i32
    return %arg0, %arg1 : i32, i32
  }
  func.func @transform_1(%arg0: i32, %arg1: i32) -> (i32, i32) {
    %c0_i32 = arith.constant 0 : i32
    %c0_i32_0 = arith.constant 0 : i32
    return %c0_i32, %arg1 : i32, i32
  }
  func.func @transform_2(%arg0: i32, %arg1: i32) -> (i32, i32) {
    %c0_i32 = arith.constant 0 : i32
    %c0_i32_0 = arith.constant 0 : i32
    %c0_i32_1 = arith.constant 0 : i32
    return %c0_i32, %c0_i32_0 : i32, i32
  }
  func.func @transform_3(%arg0: i32, %arg1: i32) -> (i32, i32) {
    %c0_i32 = arith.constant 0 : i32
    %c0_i32_0 = arith.constant 0 : i32
    %c0_i32_1 = arith.constant 0 : i32
    return %c0_i32, %c0_i32_0 : i32, i32
  }
  func.func @transform_4(%arg0: i32, %arg1: i32) -> (i32, i32) {
    %c0_i32 = arith.constant 0 : i32
    %c0_i32_0 = arith.constant 0 : i32
    %c0_i32_1 = arith.constant 0 : i32
    return %c0_i32, %c0_i32_0 : i32, i32
  }
  func.func @transform_5(%arg0: i32, %arg1: i32) -> (i32, i32) {
    %c0_i32 = arith.constant 0 : i32
    %c0_i32_0 = arith.constant 0 : i32
    return %arg0, %c0_i32 : i32, i32
  }
}

</mosaic_0001>

<bundles_post_ra>
// kernel: tpu_custom_call.1
= control target key start
LH: loop header
LB: loop body
LE: loop exit
PB: predicated region body
PF: predicated region fallthrough
CT: control target
= control target key end

     0   :  { %s1074_s0 = inlined_call_operand.hbm [shape: f32[2,1024], index: 0, kind: input, shape index: {}]   ;;  %s1075_s1 = inlined_call_operand.hbm [shape: f32[32,1024], index: 1, kind: input, shape index: {}]   ;;  %s1076_s2 = inlined_call_operand.vmem [shape: f32[1,32], index: 2, kind: input, shape index: {}]   ;;  %s1077_s3 = inlined_call_operand.hbm [shape: f32[10,32], index: 3, kind: input, shape index: {}]   ;;  %s1078_s4 = inlined_call_operand.vmem [shape: f32[1,10], index: 4, kind: input, shape index: {}]   ;;  %s1079_s5 = inlined_call_operand.hbm [shape: f32[2,10], index: 5, kind: output, shape index: {}]  }
   0x1   :  { %1081 = sst [smem:[#allocation15_spill]] %s1074_s0 }
   0x2   :  { %1082 = sst [smem:[#allocation16_spill]] %s1077_s3 }
   0x3   :  { %10 = vsyncpa [#allocation4], 0 }
   0x4   :  { %12 = vsyncpa [#allocation4 + $0x1], 0 }
   0x5   :  { %13 = vsyncpa [#allocation7], 0 }
   0x6   :  { %15 = vsyncpa [#allocation7 + $0x1], 0 }
   0x7   :  { %16 = vsyncpa [#allocation5], 0  ;;  %s916_s18 = smov 0   ;;  %s918_s19 = smov 0  }
   0x8   :  { %s920_s20 = smov 0   ;;  %s922_s21 = smov 0  }
   0x9   :  { %s924_s22 = smov 0   ;;  %s926_s23 = smov 0  }
   0xa LB: > { %s947_s24 = sadd.s32 4294967295, %s876_s23   ;;  %p586_p0 = scmp.ge.s32.totalorder %s876_s23, 1  ;;  %s876_s23 = sphi %s926_s23, %s22_s23   ;;  %s872_s22 = sphi %s924_s22, %s1095_s22   ;;  %s868_s21 = sphi %s922_s21, %s1094_s21   ;;  %s864_s20 = sphi %s920_s20, %s1093_s20   ;;  %s860_s19 = sphi %s918_s19, %s1092_s19   ;;  %s856_s18 = sphi %s916_s18, %s1091_s18  }
   0xb   : > { %p57_p1 = scmp.eq.s32.totalorder %s947_s24, 0  ;;  %p182_p2 = scmp.lt.s32.totalorder %s876_s23, 3 }
   0xc   : > { %s1083_s3 = sld [smem:[#allocation16_spill]]  ;;  %s878_s29 = smov [#allocation8]  }
   0xd   : > { %p955_p3 = pnand %p586_p0, %p182_p2  ;;  %s198_s30 = sshll.u32 %s878_s29, 4  ;;  %s199_s30 = int_to_ptr.vmem [resolvable:$true] %s198_s30 }
   0xe   : > { %s879_s6 = smov 128   ;;  %s880_s7 = smov 8  }
   0xf   : > { %p622_p4 = pneg %p955_p3  ;;  %s31_s8 = sadd.s32 1, %s872_s22 }
  0x10   : > { %p32_p6 = scmp.ge.s32.totalorder %s31_s8, 2  ;;  %s43_s9 = sadd.s32 1, %s864_s20 }
  0x11   : > { %p623_p5 = pnand %p622_p4, %p57_p1  ;;  %p50_p7 = scmp.ne.s32.totalorder %s864_s20, %s860_s19 }
  0x12   : > { %s196_s27 = sshll.u32 %s1083_s3, 4  ;;  %p51_p8 = scmp.eq.s32.totalorder %s876_s23, 0  ;;  %s197_s27 = int_to_ptr.hbm [resolvable:$true] %s196_s27 }
  0x13   : > { %625 = dma.hbm_to_vmem [thread:$0]  (!%p623_p5), %s197_s27, 256, %s199_s30, [#allocation7], %s879_s6, %s879_s6, %s880_s7  }
  0x14   : > { %s1097_s8 = smov (%p32_p6, %s31_s8), 0  ;;  %p970_p9 = por %p51_p8, %p50_p7 }
  0x15   : > { %1085 = sst [smem:[#allocation14_spill]] %s1097_s8  ;;  %p56_p10 = scmp.ne.s32.totalorder %s860_s19, %s856_s18 }
  0x16   : > { %s39_s11 = ssub.s32 %s872_s22, %s1097_s8  ;;  %p634_p11 = scmp.lt.s32.totalorder %s876_s23, 2 }
  0x17   : > { %p41_p12 = scmp.eq.s32.totalorder %s39_s11, 0  ;;  %p981_p13 = por %p57_p1, %p56_p10 }
  0x18   : > { %s215_s13 = sand.u32 1, %s864_s20   ;;  %s608_s14 = sshll.u32 %s872_s22, 3 }
  0x19   : > { %s988_s15 = scalar_select %p41_p12, %s864_s20, %s43_s9  }
  0x1a   : > { %s589_s16 = sshll.u32 %s215_s13, 3  ;;  %s1088_s0 = sld [smem:[#allocation15_spill]] }
  0x1b   : > { %s219_s18 = scalar_lea.vmem [#allocation3], %s589_s16  ;;  %p997_p0 = pnand %p634_p11, %p970_p9 }
  0x1c   : > { %s230_s29 = sshll.u32 %s219_s18, 4  ;;  %s592_s6 = sshll.u32 %s215_s13, 7  ;;  %s231_s29 = int_to_ptr.vmem [resolvable:$true] %s230_s29 }
  0x1d   : > { %s609_s7 = sshll.u32 %s872_s22, 5  ;;  %s216_s17 = scalar_lea.sflag [#allocation4], %s215_s13 }
  0x1e   : > { %s241_s25 = scalar_lea.vmem [#allocation6], %s592_s6  ;;  %s237_s10 = sand.u32 1, %s876_s23  }
  0x1f   : > { %s238_s18 = scalar_lea.sflag [#allocation7], %s237_s10  ;;  %s882_s3 = smov 512  }
  0x20   : > { %s226_s26 = scalar_lea.hbm %s1088_s0, %s608_s14  ;;  %s246_s14 = scalar_lea.hbm %s1075_s1, %s609_s7 }
  0x21   : > { %s228_s27 = sshll.u32 %s226_s26, 4  ;;  %s247_s16 = sshll.u32 %s246_s14, 4  ;;  %s229_s27 = int_to_ptr.hbm [resolvable:$true] %s228_s27  ;;  %s248_s16 = int_to_ptr.hbm [resolvable:$true] %s247_s16 }
  0x22   : > { %629 = dma.hbm_to_vmem [thread:$0]  (!%p997_p0), %s229_s27, 128, %s231_s29, %s216_s17  }
  0x23   : > { %s249_s26 = sshll.u32 %s241_s25, 4  ;;  %s881_s0 = smov 1024   ;;  %s250_s26 = int_to_ptr.vmem [resolvable:$true] %s249_s26 }
  0x24   : > { %s883_s8 = smov 32   ;;  %261 = sbr.rel (%p955_p3) target bundleno = 357 (0x165), region = 40 }
  0x25   : > { %632 = dma.hbm_to_vmem [thread:$0]  (!%p997_p0), %s248_s16, 2048, %s250_s26, %s238_s18, %s881_s0, %s882_s3, %s883_s8  }
  0x26   : > { %s263_s13 = sand.u32 (!%p955_p3), 1, %s860_s19  }
  0x27   : > { %s596_s7 = sshll.u32 (!%p955_p3), %s263_s13, 3  ;;  %s264_s27 = scalar_lea.sflag (!%p955_p3), [#allocation4], %s263_s13 }
  0x28   : > { %s267_s29 = scalar_lea.vmem (!%p955_p3), [#allocation3], %s596_s7 }
  0x29   : > { %839 = dma.done.wait (%p981_p13), %s264_s27, 128  }
  0x2a   : > { %841 = vsyncadd (%p981_p13), %s264_s27, 4294967168  ;;  %s273_s6 = sand.u32 1, %s947_s24   ;;  %s597_s9 = sshll.u32 %s263_s13, 7 }
  0x2b   : > { %s274_s30 = scalar_lea.sflag [#allocation7], %s273_s6  ;;  %s1018_s0 = scalar_lea.vmem [#allocation6], %s597_s9 }
  0x2c   : > { %843 = dma.done.wait (%p981_p13), %s274_s30, 2048  }
  0x2d   : > { %845 = vsyncadd (%p981_p13), %s274_s30, 4294965248 }
  0x2e   : > { %847 = dma.done.wait (%p57_p1), [#allocation7], 256  }
  0x2f   : > { %849 = vsyncadd (%p57_p1), [#allocation7], 4294967040  ;;  %p599_p2 = scmp.ne.s32.totalorder %s868_s21, 0 }
  0x31   : > { %315 = sbr.rel (%p599_p2) target bundleno = 56 (0x38), region = 56 }
  0x36   : > { %vm316_vm0 = vcmask 254976   ;;  %v884_v0 = vmov 0.0  }
  0x37   : > { %317 = vst.msk [vmem:[#allocation2] sm:$0x3] %vm316_vm0, %v884_v0 }
  0x38 PF: > { %v334_v1 = vld [vmem:[%s1018_s0 + $0x70] sm:$0xff]  ;;  %v335_v2 = vld [vmem:[%s1018_s0 + $0x78] sm:$0xff]  ;;  %v332_v3 = vld [vmem:[%s1018_s0 + $0x60] sm:$0xff]  ;;  %vm427_vm1 = vcmask 254976   ;;  %p600_p1 = scmp.ne.s32.totalorder %s868_s21, 1 }
  0x39   : > { %398 = vmatpush.xpose.msra.mxu2 %v334_v1  ;;  %418 = vmatpush.xpose.msra.mxu3 %v335_v2  ;;  %v333_v4 = vld [vmem:[%s1018_s0 + $0x68] sm:$0xff]  ;;  %v330_v5 = vld [vmem:[%s1018_s0 + $0x50] sm:$0xff]  ;;  %v331_v6 = vld [vmem:[%s1018_s0 + $0x58] sm:$0xff] }
  0x3a   : > { %358 = vmatpush.xpose.msra.mxu0 %v332_v3  ;;  %378 = vmatpush.xpose.msra.mxu1 %v333_v4  ;;  %v328_v7 = vld [vmem:[%s1018_s0 + $0x40] sm:$0xff]  ;;  %v329_v8 = vld [vmem:[%s1018_s0 + $0x48] sm:$0xff]  ;;  %v319_v9 = vld [vmem:[%s267_s29] sm:$0xff] }
  0x3b   : > { %337 = vst [vmem:[#allocation1] ss:$4 sm:$0xff] %v319_v9  ;;  %v326_v10 = vld [vmem:[%s1018_s0 + $0x30] sm:$0xff]  ;;  %v327_v11 = vld [vmem:[%s1018_s0 + $0x38] sm:$0xff]  ;;  %v324_v12 = vld [vmem:[%s1018_s0 + $0x20] sm:$0xff] }
  0x3c   : > { %v325_v13 = vld [vmem:[%s1018_s0 + $0x28] sm:$0xff]  ;;  %v322_v14 = vld [vmem:[%s1018_s0 + $0x10] sm:$0xff]  ;;  %v323_v15 = vld [vmem:[%s1018_s0 + $0x18] sm:$0xff] }
  0x3d   : > { %399 = vmatpush.xpose.msra.mxu2 %v330_v5  ;;  %419 = vmatpush.xpose.msra.mxu3 %v331_v6  ;;  %v320_v16 = vld [vmem:[%s1018_s0] sm:$0xff]  ;;  %v321_v17 = vld [vmem:[%s1018_s0 + $0x8] sm:$0xff] }
  0x3e   : > { %359 = vmatpush.xpose.msra.mxu0 %v328_v7  ;;  %379 = vmatpush.xpose.msra.mxu1 %v329_v8  ;;  %v318_v28 = vld [vmem:[#allocation2] sm:$0x3] }
  0x41   : > { %400 = vmatpush.xpose.msra.mxu2 %v326_v10  ;;  %420 = vmatpush.xpose.msra.mxu3 %v327_v11 }
  0x42   : > { %360 = vmatpush.xpose.msra.mxu0 %v324_v12  ;;  %380 = vmatpush.xpose.msra.mxu1 %v325_v13  ;;  %v340_v18 = vld.sshfl [vmem:[#allocation1 + $0x10] sm:$0xff pattern:$0x73625140]  ;;  %v341_v19 = vld.sshfl [vmem:[#allocation1 + $0x18] sm:$0xff pattern:$0x73625140] }
  0x43   : > { %v338_v20 = vld.sshfl [vmem:[#allocation1] sm:$0xff pattern:$0x73625140]  ;;  %v339_v21 = vld.sshfl [vmem:[#allocation1 + $0x8] sm:$0xff pattern:$0x73625140] }
  0x45   : > { %401 = vmatpush.xpose.msra.mxu2 %v322_v14  ;;  %421 = vmatpush.xpose.msra.mxu3 %v323_v15 }
  0x46   : > { %361 = vmatpush.xpose.msra.mxu0 %v320_v16  ;;  %381 = vmatpush.xpose.msra.mxu1 %v321_v17 }
  0x48   : > { %402 = vmatmul.f32.vlgmr.msra.gmra.mxu2 %v340_v18  ;;  %422 = vmatmul.f32.vlgmr.msra.gmra.mxu3 %v341_v19 }
  0x49   : > { %362 = vmatmul.f32.vlgmr.msra.gmra.mxu0 %v338_v20  ;;  %382 = vmatmul.f32.vlgmr.msra.gmra.mxu1 %v339_v21 }
  0xc6   : > { %v363_v22 = vpop.f32.mrf.mxu0  ;;  %v383_v23 = vpop.f32.mrf.mxu1 }
  0xc7   : > { %v384_v24 = vadd.f32 %v383_v23, %v363_v22 }
  0xcb   : > { %v403_v25 = vpop.f32.mrf.mxu2  ;;  %v423_v26 = vpop.f32.mrf.mxu3 }
  0xcc   : > { %v404_v27 = vadd.f32 %v403_v25, %v384_v24 }
  0xce   : > { %v424_v29 = vadd.f32 %v423_v26, %v404_v27  ;;  %432 = sbr.rel (%p600_p1) target bundleno = 351 (0x15f), region = 60 }
  0xd0   : > { %v426_v30 = vadd.f32 %v424_v29, %v318_v28 }
  0xd2   : > { %428 = vst.msk [vmem:[#allocation2] sm:$0x3] %vm427_vm1, %v426_v30 }
  0xd3   : > { %v441_v31 = vld [vmem:[#allocation8 + $0x8] sm:$0x3]  ;;  %vm446_vm2 = vcmask 261120   ;;  %v694_v33 = vld [vmem:[%s1076_s2] ss:$0 sm:$0xff]  ;;  %vm476_vm3 = vcmask 74752  }
  0xd4   : > { %601 = vmatpush.xpose.msk.msra.mxu0 %vm446_vm2, %v441_v31  ;;  %v440_v34 = vld [vmem:[#allocation8] sm:$0xff] }
  0xd5   : > { %v695_v37 = vld [vmem:[%s1078_s4] ss:$0 sm:$0xff] }
  0xd8   : > { %602 = vmatpush.xpose.msk.msra.mxu0 %vm446_vm2, %v440_v34 }
  0xd9   : > { %v433_v32 = vld [vmem:[#allocation2] sm:$0x3] }
  0xda   : > { %v438_v35 = vadd.f32 %v694_v33, %v433_v32 }
  0xdc   : > { %v439_v36 = vmax.f32 %v438_v35, 0.0 }
  0xde   : > { %603 = vmatmul.msk.f32.vlgmr.msra.gmra.mxu0 %vm446_vm2, %v439_v36 }
 0x15b   : > { %v473_v38 = vpop.f32.mrf.mxu0 }
 0x15c   : > { %v474_v39 = vadd.f32 %v695_v37, %v473_v38 }
 0x15e   : > { %477 = vst.msk [vmem:[#allocation9] sm:$0x3] %vm476_vm3, %v474_v39 }
 0x15f PF: > { %p636_p3 = scmp.eq.s32.totalorder %s947_s24, 1  ;;  %s488_s14 = sshll.u32 %s1079_s5, 4  ;;  %s489_s14 = int_to_ptr.hbm [resolvable:$true] %s488_s14 }
 0x160   : > { %s885_s17 = smov [#allocation9]  }
 0x161   : > { %s486_s16 = sshll.u32 %s885_s17, 4  ;;  %s487_s16 = int_to_ptr.vmem [resolvable:$true] %s486_s16 }
 0x162   : > { %619 = dma.vmem_to_hbm [thread:$0]  (%p636_p3), %s487_s16, 32, %s489_s14, [#allocation5]  }
 0x163   : > { %851 = dma.done.wait (%p636_p3), [#allocation5], 32  }
 0x164   : > { %853 = vsyncadd (%p636_p3), [#allocation5], 4294967264 }
 0x165 PF: > { %s22_s23 = sadd.s32 1, %s876_s23   ;;  %s1090_s24 = sld [smem:[#allocation14_spill]] }
 0x166   : > { %p19_p4 = scmp.ge.s32.totalorder %s22_s23, 4   ;;  %s1091_s18 = smov %s860_s19 }
 0x167   : > { %s1092_s19 = smov %s864_s20  ;;  %s1093_s20 = smov %s988_s15 }
 0x168   : > { %s1094_s21 = smov %s872_s22  ;;  %21 = sbr.rel (!%p19_p4) target bundleno = 10 (0xa), region = 103 }
 0x16b   : > { %s1095_s22 = smov %s1090_s24 }
 0x16d   :  { %502 = vsyncpa [#allocation4], 1 }
 0x16e   :  { %504 = vsyncpa [#allocation4 + $0x1], 1 }
 0x16f   :  { %505 = vsyncpa [#allocation7], 1 }
 0x170   :  { %507 = vsyncpa [#allocation7 + $0x1], 1 }
 0x171   :  { %508 = vsyncpa [#allocation5], 1 }
 0x172   :  { %510 = vsyncpa [#allocation5 + $0x1], 1 }

</bundles_post_ra>
